<compile_context>
chip_gen: v7x
topology: tpu7x:2x2x1
jax: 0.10.0
libtpu: 0.0.40
codegen_flags: <defaults>
</compile_context>

<pallas_src>
import math

import jax
import jax.numpy as jnp
from jax.experimental import pallas as pl
from jax.experimental.pallas import tpu as pltpu

# ----------------------------- configuration ------------------------------
IN_DIM = 4
COND_DIM = 1
TIME_DIM = 1
FUSED_IN = IN_DIM + COND_DIM + TIME_DIM   # 6 = concat([x, c, t], axis=-1)
DIM = 32
DEPTH = 2
EXPANSION = 4.0
HIDDEN = int(EXPANSION * DIM)             # 128
OUT_PAD = 128                             # lane-dense padded output width
BATCH = 256
TB = 128                                  # batch tile; grid = BATCH // TB

# Flip to True on v6e/v7x for the native bf16 MXU path (f32 accumulation kept);
# note this loosens the tolerance vs. the f32 PyTorch reference.
USE_BF16_MATMUL = False


def _gelu_exact(z):
    # PyTorch nn.GELU() default: exact erf formulation.
    return 0.5 * z * (1.0 + jax.lax.erf(z * (1.0 / math.sqrt(2.0))))


# ------------------------------- kernel -----------------------------------
def conditional_net_kernel(
    xct_ref,                 # (TB, FUSED_IN)      fused [x | c | t]
    w_in_ref, b_in_ref,      # (FUSED_IN, DIM), (1, DIM)   fused input/cond/time proj
    w1_ref, b1_ref,          # (DEPTH, DIM, HIDDEN), (DEPTH, 1, HIDDEN)
    w2_ref, b2_ref,          # (DEPTH, HIDDEN, DIM), (DEPTH, 1, DIM)
    wo_ref, bo_ref,          # (DIM, OUT_PAD), (1, OUT_PAD)  zero-padded output proj
    o_ref,                   # (TB, OUT_PAD)
):
    cdt = jnp.bfloat16 if USE_BF16_MATMUL else jnp.float32

    xct = xct_ref[...].astype(cdt)

    # Single fused projection (replaces x@wi + c@wc + t@wt; bias = bi+bc+bt).
    h = jnp.dot(xct, w_in_ref[...].astype(cdt),
                preferred_element_type=jnp.float32) + b_in_ref[...]

    # Residual MLP blocks: DEPTH=2 is a static Python unroll (LLO visibility).
    for d in range(DEPTH):
        z = jnp.dot(h.astype(cdt), w1_ref[d].astype(cdt),
                    preferred_element_type=jnp.float32) + b1_ref[d]
        z = _gelu_exact(z)
        z = jnp.dot(z.astype(cdt), w2_ref[d].astype(cdt),
                    preferred_element_type=jnp.float32) + b2_ref[d]
        h = z + h

    # Lane-dense (128-wide) output store; pad columns of wo/bo are zero.
    out = jnp.dot(h.astype(cdt), wo_ref[...].astype(cdt),
                  preferred_element_type=jnp.float32) + bo_ref[...]
    o_ref[...] = out.astype(o_ref.dtype)


# ------------------------------- wrapper -----------------------------------
def conditional_net(x, c, t, params):
    B = x.shape[0]
    tb = min(TB, B)
    assert B % tb == 0, "batch must be divisible by the batch tile"
    grid = (B // tb,)

    # Fuse the three inputs so the projection phase is one MXU push.
    xct = jnp.concatenate([x, c, t], axis=1)          # (B, FUSED_IN)

    def full_spec(shape):
        nd = len(shape)
        return pl.BlockSpec(shape, lambda i, _nd=nd: (0,) * _nd)

    in_specs = [
        pl.BlockSpec((tb, FUSED_IN), lambda i: (i, 0)),        # [x|c|t]
        full_spec(params["w_in"].shape), full_spec(params["b_in"].shape),
        full_spec(params["w1"].shape), full_spec(params["b1"].shape),
        full_spec(params["w2"].shape), full_spec(params["b2"].shape),
        full_spec(params["wo_pad"].shape), full_spec(params["bo_pad"].shape),
    ]
    out_specs = pl.BlockSpec((tb, OUT_PAD), lambda i: (i, 0))

    out_padded = pl.pallas_call(
        conditional_net_kernel,
        out_shape=jax.ShapeDtypeStruct((B, OUT_PAD), x.dtype),
        grid=grid,
        in_specs=in_specs,
        out_specs=out_specs,
        compiler_params=pltpu.CompilerParams(
            # Batch axis is independent -> shards across the 2 TCs on v7x.
            dimension_semantics=("parallel",)),
    )(
        xct,
        params["w_in"], params["b_in"],
        params["w1"], params["b1"],
        params["w2"], params["b2"],
        params["wo_pad"], params["bo_pad"],
    )

    # Strip the lane padding back to the real output width.
    return out_padded[:, :IN_DIM]


# --------------------------- parameter init --------------------------------
def _linear_init(key, fan_in, fan_out):
    # PyTorch-style uniform(-1/sqrt(fan_in), 1/sqrt(fan_in)); weight stored (in, out).
    kw, kb = jax.random.split(key)
    bound = 1.0 / math.sqrt(fan_in)
    w = jax.random.uniform(kw, (fan_in, fan_out), jnp.float32, -bound, bound)
    b = jax.random.uniform(kb, (fan_out,), jnp.float32, -bound, bound)
    return w, b


def make_params(key):
    keys = jax.random.split(key, 4 + 2 * DEPTH)
    wi, bi = _linear_init(keys[0], IN_DIM, DIM)
    wc, bc = _linear_init(keys[1], COND_DIM, DIM)
    wt, bt = _linear_init(keys[2], TIME_DIM, DIM)
    wo, bo = _linear_init(keys[3], DIM, IN_DIM)
    w1s, b1s, w2s, b2s = [], [], [], []
    for d in range(DEPTH):
        w1, b1 = _linear_init(keys[4 + 2 * d], DIM, HIDDEN)
        w2, b2 = _linear_init(keys[5 + 2 * d], HIDDEN, DIM)
        w1s.append(w1); b1s.append(b1); w2s.append(w2); b2s.append(b2)

    # Fused input/cond/time projection:  [x|c|t] @ w_in + b_in
    w_in = jnp.concatenate([wi, wc, wt], axis=0)            # (FUSED_IN, DIM)
    b_in = (bi + bc + bt).reshape(1, DIM)

    # Lane-dense zero-padded output projection (columns >= IN_DIM are zero).
    wo_pad = jnp.zeros((DIM, OUT_PAD), jnp.float32).at[:, :IN_DIM].set(wo)
    bo_pad = jnp.zeros((1, OUT_PAD), jnp.float32).at[0, :IN_DIM].set(bo)

    return {
        # raw (un-fused) params for the pure-JAX reference
        "wi": wi, "bi": bi, "wc": wc, "bc": bc, "wt": wt, "bt": bt,
        "wo": wo, "bo": bo,
        # kernel-packed params
        "w_in": w_in, "b_in": b_in,
        "w1": jnp.stack(w1s),                                   # (DEPTH, DIM, HIDDEN)
        "b1": jnp.stack(b1s).reshape(DEPTH, 1, HIDDEN),
        "w2": jnp.stack(w2s),                                   # (DEPTH, HIDDEN, DIM)
        "b2": jnp.stack(b2s).reshape(DEPTH, 1, DIM),
        "wo_pad": wo_pad, "bo_pad": bo_pad,
    }


# --------------------------- pure-JAX reference -----------------------------
def reference(x, c, t, p):
    # Mirrors the PyTorch module structure (un-fused projections).
    h = x @ p["wi"] + p["bi"]
    h = h + (c @ p["wc"] + p["bc"]) + (t @ p["wt"] + p["bt"])
    for d in range(DEPTH):
        z = _gelu_exact(h @ p["w1"][d] + p["b1"][d])
        z = z @ p["w2"][d] + p["b2"][d]
        h = z + h
    return h @ p["wo"] + p["bo"]


# --------------------------------- main -------------------------------------
if __name__ == "__main__":
    key = jax.random.PRNGKey(0)
    kx, kc, kt, kp = jax.random.split(key, 4)

    x = jax.random.normal(kx, (BATCH, IN_DIM), jnp.float32)
    c = jax.random.normal(kc, (BATCH, COND_DIM), jnp.float32)
    t = jax.random.uniform(kt, (BATCH, TIME_DIM), jnp.float32)
    params = make_params(kp)

    out = jax.block_until_ready(conditional_net(x, c, t, params))

    ref = reference(x, c, t, params)
    assert out.shape == (BATCH, IN_DIM)
    tol = 2e-2 if USE_BF16_MATMUL else 1e-4
    assert jnp.allclose(out, ref, atol=tol, rtol=tol), "mismatch vs reference"

    print("KERNEL_OK")
</pallas_src>

<mosaic_0001>
module attributes {stable_mosaic.version = 11 : i64} {
  func.func @conditional_net_kernel(%arg0: i32, %arg1: memref<128x6xf32, #tpu.memory_space<vmem>>, %arg2: memref<6x32xf32, #tpu.memory_space<vmem>>, %arg3: memref<1x32xf32, #tpu.memory_space<vmem>>, %arg4: memref<2x32x128xf32, #tpu.memory_space<vmem>>, %arg5: memref<2x1x128xf32, #tpu.memory_space<vmem>>, %arg6: memref<2x128x32xf32, #tpu.memory_space<vmem>>, %arg7: memref<2x1x32xf32, #tpu.memory_space<vmem>>, %arg8: memref<32x128xf32, #tpu.memory_space<vmem>>, %arg9: memref<1x128xf32, #tpu.memory_space<vmem>>, %arg10: memref<128x128xf32, #tpu.memory_space<vmem>>) attributes {dimension_semantics = [#tpu.dimension_semantics<parallel>], iteration_bounds = array<i64: 2>, scalar_prefetch = 0 : i64, scratch_operands = 0 : i64, tpu.core_type = #tpu.core_type<tc>, window_params = [{transform_indices = @transform_0, window_bounds = array<i64: 128, 6>}, {pipeline_mode = #tpu.pipeline_mode<synchronous>, transform_indices = @transform_1, window_bounds = array<i64: 6, 32>}, {pipeline_mode = #tpu.pipeline_mode<synchronous>, transform_indices = @transform_2, window_bounds = array<i64: 1, 32>}, {pipeline_mode = #tpu.pipeline_mode<synchronous>, transform_indices = @transform_3, window_bounds = array<i64: 2, 32, 128>}, {pipeline_mode = #tpu.pipeline_mode<synchronous>, transform_indices = @transform_4, window_bounds = array<i64: 2, 1, 128>}, {pipeline_mode = #tpu.pipeline_mode<synchronous>, transform_indices = @transform_5, window_bounds = array<i64: 2, 128, 32>}, {pipeline_mode = #tpu.pipeline_mode<synchronous>, transform_indices = @transform_6, window_bounds = array<i64: 2, 1, 32>}, {pipeline_mode = #tpu.pipeline_mode<synchronous>, transform_indices = @transform_7, window_bounds = array<i64: 32, 128>}, {pipeline_mode = #tpu.pipeline_mode<synchronous>, transform_indices = @transform_8, window_bounds = array<i64: 1, 128>}, {transform_indices = @transform_9, window_bounds = array<i64: 128, 128>}]} {
    %c0 = arith.constant 0 : index
    %c0_0 = arith.constant 0 : index
    %0 = vector.load %arg1[%c0, %c0_0] : memref<128x6xf32, #tpu.memory_space<vmem>>, vector<128x6xf32>
    %c0_1 = arith.constant 0 : index
    %c0_2 = arith.constant 0 : index
    %1 = vector.load %arg2[%c0_1, %c0_2] : memref<6x32xf32, #tpu.memory_space<vmem>>, vector<6x32xf32>
    %cst = arith.constant dense<0.000000e+00> : vector<128x32xf32>
    %2 = tpu.matmul %0, %1, %cst {dimension_numbers = #tpu.dot_dimension_numbers<[1], [0], [0], [1], [0, 0, 1, 1], [], []>} : vector<128x6xf32>, vector<6x32xf32>, vector<128x32xf32> -> vector<128x32xf32>
    %c0_3 = arith.constant 0 : index
    %c0_4 = arith.constant 0 : index
    %3 = vector.load %arg3[%c0_3, %c0_4] : memref<1x32xf32, #tpu.memory_space<vmem>>, vector<1x32xf32>
    %4 = vector.broadcast %3 : vector<1x32xf32> to vector<128x32xf32>
    %5 = arith.addf %2, %4 : vector<128x32xf32>
    %c0_5 = arith.constant 0 : index
    %c0_6 = arith.constant 0 : index
    %c0_7 = arith.constant 0 : index
    %6 = vector.load %arg4[%c0_5, %c0_6, %c0_7] : memref<2x32x128xf32, #tpu.memory_space<vmem>>, vector<1x32x128xf32>
    %7 = vector.shape_cast %6 : vector<1x32x128xf32> to vector<32x128xf32>
    %cst_8 = arith.constant dense<0.000000e+00> : vector<128x128xf32>
    %8 = tpu.matmul %5, %7, %cst_8 {dimension_numbers = #tpu.dot_dimension_numbers<[1], [0], [0], [1], [0, 0, 1, 1], [], []>} : vector<128x32xf32>, vector<32x128xf32>, vector<128x128xf32> -> vector<128x128xf32>
    %c0_9 = arith.constant 0 : index
    %c0_10 = arith.constant 0 : index
    %c0_11 = arith.constant 0 : index
    %9 = vector.load %arg5[%c0_9, %c0_10, %c0_11] : memref<2x1x128xf32, #tpu.memory_space<vmem>>, vector<1x1x128xf32>
    %10 = vector.shape_cast %9 : vector<1x1x128xf32> to vector<1x128xf32>
    %11 = vector.broadcast %10 : vector<1x128xf32> to vector<128x128xf32>
    %12 = arith.addf %8, %11 : vector<128x128xf32>
    %cst_12 = arith.constant 5.000000e-01 : f32
    %13 = vector.broadcast %cst_12 : f32 to vector<128x128xf32>
    %14 = arith.mulf %13, %12 : vector<128x128xf32>
    %cst_13 = arith.constant 0.707106769 : f32
    %15 = vector.broadcast %cst_13 : f32 to vector<128x128xf32>
    %16 = arith.mulf %12, %15 : vector<128x128xf32>
    %17 = math.erf %16 : vector<128x128xf32>
    %cst_14 = arith.constant 1.000000e+00 : f32
    %18 = vector.broadcast %cst_14 : f32 to vector<128x128xf32>
    %19 = arith.addf %18, %17 : vector<128x128xf32>
    %20 = arith.mulf %14, %19 : vector<128x128xf32>
    %c0_15 = arith.constant 0 : index
    %c0_16 = arith.constant 0 : index
    %c0_17 = arith.constant 0 : index
    %21 = vector.load %arg6[%c0_15, %c0_16, %c0_17] : memref<2x128x32xf32, #tpu.memory_space<vmem>>, vector<1x128x32xf32>
    %22 = vector.shape_cast %21 : vector<1x128x32xf32> to vector<128x32xf32>
    %cst_18 = arith.constant dense<0.000000e+00> : vector<128x32xf32>
    %23 = tpu.matmul %20, %22, %cst_18 {dimension_numbers = #tpu.dot_dimension_numbers<[1], [0], [0], [1], [0, 0, 1, 1], [], []>} : vector<128x128xf32>, vector<128x32xf32>, vector<128x32xf32> -> vector<128x32xf32>
    %c0_19 = arith.constant 0 : index
    %c0_20 = arith.constant 0 : index
    %c0_21 = arith.constant 0 : index
    %24 = vector.load %arg7[%c0_19, %c0_20, %c0_21] : memref<2x1x32xf32, #tpu.memory_space<vmem>>, vector<1x1x32xf32>
    %25 = vector.shape_cast %24 : vector<1x1x32xf32> to vector<1x32xf32>
    %26 = vector.broadcast %25 : vector<1x32xf32> to vector<128x32xf32>
    %27 = arith.addf %23, %26 : vector<128x32xf32>
    %28 = arith.addf %27, %5 : vector<128x32xf32>
    %c1 = arith.constant 1 : index
    %c0_22 = arith.constant 0 : index
    %c0_23 = arith.constant 0 : index
    %29 = vector.load %arg4[%c1, %c0_22, %c0_23] : memref<2x32x128xf32, #tpu.memory_space<vmem>>, vector<1x32x128xf32>
    %30 = vector.shape_cast %29 : vector<1x32x128xf32> to vector<32x128xf32>
    %cst_24 = arith.constant dense<0.000000e+00> : vector<128x128xf32>
    %31 = tpu.matmul %28, %30, %cst_24 {dimension_numbers = #tpu.dot_dimension_numbers<[1], [0], [0], [1], [0, 0, 1, 1], [], []>} : vector<128x32xf32>, vector<32x128xf32>, vector<128x128xf32> -> vector<128x128xf32>
    %c1_25 = arith.constant 1 : index
    %c0_26 = arith.constant 0 : index
    %c0_27 = arith.constant 0 : index
    %32 = vector.load %arg5[%c1_25, %c0_26, %c0_27] : memref<2x1x128xf32, #tpu.memory_space<vmem>>, vector<1x1x128xf32>
    %33 = vector.shape_cast %32 : vector<1x1x128xf32> to vector<1x128xf32>
    %34 = vector.broadcast %33 : vector<1x128xf32> to vector<128x128xf32>
    %35 = arith.addf %31, %34 : vector<128x128xf32>
    %cst_28 = arith.constant 5.000000e-01 : f32
    %36 = vector.broadcast %cst_28 : f32 to vector<128x128xf32>
    %37 = arith.mulf %36, %35 : vector<128x128xf32>
    %cst_29 = arith.constant 0.707106769 : f32
    %38 = vector.broadcast %cst_29 : f32 to vector<128x128xf32>
    %39 = arith.mulf %35, %38 : vector<128x128xf32>
    %40 = math.erf %39 : vector<128x128xf32>
    %cst_30 = arith.constant 1.000000e+00 : f32
    %41 = vector.broadcast %cst_30 : f32 to vector<128x128xf32>
    %42 = arith.addf %41, %40 : vector<128x128xf32>
    %43 = arith.mulf %37, %42 : vector<128x128xf32>
    %c1_31 = arith.constant 1 : index
    %c0_32 = arith.constant 0 : index
    %c0_33 = arith.constant 0 : index
    %44 = vector.load %arg6[%c1_31, %c0_32, %c0_33] : memref<2x128x32xf32, #tpu.memory_space<vmem>>, vector<1x128x32xf32>
    %45 = vector.shape_cast %44 : vector<1x128x32xf32> to vector<128x32xf32>
    %cst_34 = arith.constant dense<0.000000e+00> : vector<128x32xf32>
    %46 = tpu.matmul %43, %45, %cst_34 {dimension_numbers = #tpu.dot_dimension_numbers<[1], [0], [0], [1], [0, 0, 1, 1], [], []>} : vector<128x128xf32>, vector<128x32xf32>, vector<128x32xf32> -> vector<128x32xf32>
    %c1_35 = arith.constant 1 : index
    %c0_36 = arith.constant 0 : index
    %c0_37 = arith.constant 0 : index
    %47 = vector.load %arg7[%c1_35, %c0_36, %c0_37] : memref<2x1x32xf32, #tpu.memory_space<vmem>>, vector<1x1x32xf32>
    %48 = vector.shape_cast %47 : vector<1x1x32xf32> to vector<1x32xf32>
    %49 = vector.broadcast %48 : vector<1x32xf32> to vector<128x32xf32>
    %50 = arith.addf %46, %49 : vector<128x32xf32>
    %51 = arith.addf %50, %28 : vector<128x32xf32>
    %c0_38 = arith.constant 0 : index
    %c0_39 = arith.constant 0 : index
    %52 = vector.load %arg8[%c0_38, %c0_39] : memref<32x128xf32, #tpu.memory_space<vmem>>, vector<32x128xf32>
    %cst_40 = arith.constant dense<0.000000e+00> : vector<128x128xf32>
    %53 = tpu.matmul %51, %52, %cst_40 {dimension_numbers = #tpu.dot_dimension_numbers<[1], [0], [0], [1], [0, 0, 1, 1], [], []>} : vector<128x32xf32>, vector<32x128xf32>, vector<128x128xf32> -> vector<128x128xf32>
    %c0_41 = arith.constant 0 : index
    %c0_42 = arith.constant 0 : index
    %54 = vector.load %arg9[%c0_41, %c0_42] : memref<1x128xf32, #tpu.memory_space<vmem>>, vector<1x128xf32>
    %55 = vector.broadcast %54 : vector<1x128xf32> to vector<128x128xf32>
    %56 = arith.addf %53, %55 : vector<128x128xf32>
    %c0_43 = arith.constant 0 : index
    %c0_44 = arith.constant 0 : index
    %57 = vector.load %arg10[%c0_43, %c0_44] : memref<128x128xf32, #tpu.memory_space<vmem>>, vector<128x128xf32>
    tpu.vector_store %arg10[%c0_43, %c0_44], %56 {strides = array<i32>} : memref<128x128xf32, #tpu.memory_space<vmem>>, vector<128x128xf32>,
    return
  }
  func.func @transform_0(%arg0: i32) -> (i32, i32) {
    %c0_i32 = arith.constant 0 : i32
    %c0_i32_0 = arith.constant 0 : i32
    return %arg0, %c0_i32 : i32, i32
  }
  func.func @transform_1(%arg0: i32) -> (i32, i32) {
    %c0_i32 = arith.constant 0 : i32
    %c0_i32_0 = arith.constant 0 : i32
    %c0_i32_1 = arith.constant 0 : i32
    return %c0_i32, %c0_i32_0 : i32, i32
  }
  func.func @transform_2(%arg0: i32) -> (i32, i32) {
    %c0_i32 = arith.constant 0 : i32
    %c0_i32_0 = arith.constant 0 : i32
    %c0_i32_1 = arith.constant 0 : i32
    return %c0_i32, %c0_i32_0 : i32, i32
  }
  func.func @transform_3(%arg0: i32) -> (i32, i32, i32) {
    %c0_i32 = arith.constant 0 : i32
    %c0_i32_0 = arith.constant 0 : i32
    %c0_i32_1 = arith.constant 0 : i32
    %c0_i32_2 = arith.constant 0 : i32
    return %c0_i32, %c0_i32_0, %c0_i32_1 : i32, i32, i32
  }
  func.func @transform_4(%arg0: i32) -> (i32, i32, i32) {
    %c0_i32 = arith.constant 0 : i32
    %c0_i32_0 = arith.constant 0 : i32
    %c0_i32_1 = arith.constant 0 : i32
    %c0_i32_2 = arith.constant 0 : i32
    return %c0_i32, %c0_i32_0, %c0_i32_1 : i32, i32, i32
  }
  func.func @transform_5(%arg0: i32) -> (i32, i32, i32) {
    %c0_i32 = arith.constant 0 : i32
    %c0_i32_0 = arith.constant 0 : i32
    %c0_i32_1 = arith.constant 0 : i32
    %c0_i32_2 = arith.constant 0 : i32
    return %c0_i32, %c0_i32_0, %c0_i32_1 : i32, i32, i32
  }
  func.func @transform_6(%arg0: i32) -> (i32, i32, i32) {
    %c0_i32 = arith.constant 0 : i32
    %c0_i32_0 = arith.constant 0 : i32
    %c0_i32_1 = arith.constant 0 : i32
    %c0_i32_2 = arith.constant 0 : i32
    return %c0_i32, %c0_i32_0, %c0_i32_1 : i32, i32, i32
  }
  func.func @transform_7(%arg0: i32) -> (i32, i32) {
    %c0_i32 = arith.constant 0 : i32
    %c0_i32_0 = arith.constant 0 : i32
    %c0_i32_1 = arith.constant 0 : i32
    return %c0_i32, %c0_i32_0 : i32, i32
  }
  func.func @transform_8(%arg0: i32) -> (i32, i32) {
    %c0_i32 = arith.constant 0 : i32
    %c0_i32_0 = arith.constant 0 : i32
    %c0_i32_1 = arith.constant 0 : i32
    return %c0_i32, %c0_i32_0 : i32, i32
  }
  func.func @transform_9(%arg0: i32) -> (i32, i32) {
    %c0_i32 = arith.constant 0 : i32
    %c0_i32_0 = arith.constant 0 : i32
    return %arg0, %c0_i32 : i32, i32
  }
}

</mosaic_0001>

<bundles_post_ra>
// kernel: tpu_custom_call.1
= control target key start
LH: loop header
LB: loop body
LE: loop exit
PB: predicated region body
PF: predicated region fallthrough
CT: control target
= control target key end

     0   :  { %14 = vsyncpa [#allocation3], 0  ;;  %s3132_s0 = inlined_call_operand.vmem [shape: f32[256,6], index: 0, kind: input, shape index: {}]   ;;  %s3133_s1 = inlined_call_operand.vmem [shape: f32[6,32], index: 1, kind: input, shape index: {}]   ;;  %s3134_s2 = inlined_call_operand.vmem [shape: f32[1,32], index: 2, kind: input, shape index: {}]   ;;  %s3135_s3 = inlined_call_operand.vmem [shape: f32[2,32,128], index: 3, kind: input, shape index: {}]   ;;  %s3136_s4 = inlined_call_operand.vmem [shape: f32[2,1,128], index: 4, kind: input, shape index: {}]   ;;  %s3137_s5 = inlined_call_operand.vmem [shape: f32[2,128,32], index: 5, kind: input, shape index: {}]   ;;  %s3138_s6 = inlined_call_operand.vmem [shape: f32[2,1,32], index: 6, kind: input, shape index: {}]   ;;  %s3139_s7 = inlined_call_operand.vmem [shape: f32[32,128], index: 7, kind: input, shape index: {}]   ;;  %s3140_s8 = inlined_call_operand.vmem [shape: f32[1,128], index: 8, kind: input, shape index: {}]   ;;  %s3141_s9 = inlined_call_operand.hbm [shape: f32[256,128], index: 9, kind: output, shape index: {}]  }
   0x1   :  { %16 = vsyncpa [#allocation3 + $0x1], 0  ;;  %s2584_s30 = smov 0   ;;  %s2586_s10 = smov 0  }
   0x2   :  { %s2588_s11 = smov 0   ;;  %s2590_s12 = smov 0  }
   0x3 LB: > { %s2605_s13 = sadd.s32 4294967295, %s2529_s12   ;;  %s1793_s14 = sadd.s32 4294967294, %s2529_s12   ;;  %s2529_s12 = sphi %s2590_s12, %s3147_s12   ;;  %s2525_s11 = sphi %s2588_s11, %s3146_s11   ;;  %s2521_s10 = sphi %s2586_s10, %s3145_s10   ;;  %s2517_s30 = sphi %s2584_s30, %s3144_s30  }
   0x4   : > { %s2609_s15 = sadd.s32 1, %s2529_s12   ;;  %s223_s16 = sadd.s32 1, %s2525_s11 }
   0x5   : > { %s220_s17 = ssub.s32 %s2529_s12, %s2609_s15  ;;  %p233_p0 = scmp.ne.s32.totalorder %s2525_s11, %s2521_s10 }
   0x6   : > { %p221_p1 = scmp.eq.s32.totalorder %s220_s17, 0  ;;  %p234_p2 = scmp.eq.s32.totalorder %s2605_s13, 1 }
   0x7   : > { %p239_p3 = scmp.ne.s32.totalorder %s2521_s10, %s2517_s30  ;;  %p240_p4 = scmp.eq.s32.totalorder %s1793_s14, 1 }
   0x8   : > { %s2620_s18 = scalar_select %p221_p1, %s2525_s11, %s223_s16  }
   0x9   : > { %p2622_p5 = por %p234_p2, %p233_p0  ;;  %p2626_p6 = por %p240_p4, %p239_p3 }
   0xa   : > { %p1796_p7 = scmp.ge.s32.totalorder %s2529_s12, 1  ;;  %p291_p8 = scmp.lt.s32.totalorder %s2529_s12, 3 }
   0xc   : > { %p292_p9 = pnand %p1796_p7, %p291_p8 }
   0xd   : > { %v350_v0 = vld [vmem:[%s3133_s1] sm:$0x3f] (!%p292_p9)  ;;  %vm407_vm0 = vcmask (!%p292_p9), 1045504   ;;  %s1798_s23 = sshll.u32 (!%p292_p9), %s2605_s13, 4  ;;  %v557_v2 = vld [vmem:[%s3135_s3 + $0x8] sm:$0xff] (!%p292_p9)  ;;  %vm358_vm1 = vcmask (!%p292_p9), 48128  }
   0xe   : > { %295 = sbr.rel (%p292_p9) target bundleno = 1402 (0x57a), region = 56  ;;  %v556_v1 = vld [vmem:[%s3135_s3] sm:$0xff] (!%p292_p9)  ;;  %2040 = vmatprep.subr.msk.mxu0 (!%p292_p9), %vm407_vm0, %v350_v0  ;;  %p328_p10 = scmp.lt.s32.totalorder (!%p292_p9), %s1798_s23, 31  ;;  %v558_v20 = vld [vmem:[%s3135_s3 + $0x10] sm:$0xff] (!%p292_p9)  ;;  %v559_v21 = vld [vmem:[%s3135_s3 + $0x18] sm:$0xff] (!%p292_p9)  ;;  %vm567_vm2 = vcmask (!%p292_p9), 261120  }
   0xf   : > { %2041 = vmatpush3.msk.msra.mxu0 (!%p292_p9), %vm407_vm0, %v350_v0  ;;  %v2274_v3 = vpack.c.bf16 (!%p292_p9), %v557_v2, %v556_v1  ;;  %v2278_v22 = vpack.c.bf16 (!%p292_p9), %v559_v21, %v558_v20  ;;  %v841_v23 = vld [vmem:[%s3137_s5] sm:$0xff] (!%p292_p9)  ;;  %v842_v24 = vld [vmem:[%s3137_s5 + $0x8] sm:$0xff] (!%p292_p9)  ;;  %v843_v25 = vld [vmem:[%s3137_s5 + $0x10] sm:$0xff] (!%p292_p9)  ;;  %s324_s14 = sand.u32 (!%p292_p9), 1, %s2521_s10   ;;  %s2531_s29 = smov (!%p292_p9), [#allocation2]  }
  0x10   : > { %v2282_v26 = vpack.c.bf16 (!%p292_p9), %v842_v24, %v841_v23  ;;  %v844_v27 = vld [vmem:[%s3137_s5 + $0x18] sm:$0xff] (!%p292_p9)  ;;  %v845_v29 = vld [vmem:[%s3137_s5 + $0x20] sm:$0xff] (!%p292_p9)  ;;  %v846_v30 = vld [vmem:[%s3137_s5 + $0x28] sm:$0xff] (!%p292_p9) }
  0x11   : > { %2275 = vmatprep.subr.bf16.mxu1 (!%p292_p9), %v2274_v3  ;;  %v2286_v28 = vpack.c.bf16 (!%p292_p9), %v844_v27, %v843_v25  ;;  %v2290_v31 = vpack.c.bf16 (!%p292_p9), %v846_v30, %v845_v29  ;;  %v1800_v32 = vld [vmem:[%s3134_s2] ss:$0 sm:$0xff] (!%p292_p9)  ;;  %v847_v1 = vld [vmem:[%s3137_s5 + $0x30] sm:$0xff] (!%p292_p9)  ;;  %v848_v2 = vld [vmem:[%s3137_s5 + $0x38] sm:$0xff] (!%p292_p9) }
  0x12   : > { %2277 = vmatpush3.bf16.msra.mxu1 (!%p292_p9), %v2274_v3  ;;  %2283 = vmatprep.subr.bf16.mxu0 (!%p292_p9), %v2282_v26  ;;  %v2294_v3 = vpack.c.bf16 (!%p292_p9), %v848_v2, %v847_v1  ;;  %v1839_v20 = vld [vmem:[%s3135_s3 + $0x38] sm:$0xff] (!%p292_p9) }
  0x13   : > { %2279 = vmatprep.subr.bf16.mxu1 (!%p292_p9), %v2278_v22 }
  0x15   : > { %s3149_s23 = smov (!%p328_p10, %s1798_s23), 31 }
  0x16   : > { %s1799_s28 = sshll.u32 %s3149_s23, 3  ;;  %2281 = vmatpush3.bf16.msra.mxu1 %v2278_v22  ;;  %v2815_v22 = vld [vmem:[%s3136_s4] ss:$0 sm:$0xff]  ;;  %s1898_s23 = sshll.u32 %s2605_s13, 11 }
  0x17   : > { %s2645_s16 = scalar_lea.vmem %s3132_s0, %s1799_s28  ;;  %s3083_s27 = scalar_lea.hbm %s3141_s9, %s1898_s23 }
  0x18   : > { %v334_v4 = vld [vmem:[%s2645_s16] sm:$0xff]  ;;  %v335_v5 = vld [vmem:[%s2645_s16 + $0x8] sm:$0xff]  ;;  %v336_v6 = vld [vmem:[%s2645_s16 + $0x10] sm:$0xff]  ;;  %s3091_s13 = scalar_lea.sflag [#allocation3], %s324_s14 }
  0x19   : > { %2042 = vmatprep.mubr.msk.f32.mxu0 %vm358_vm1, %v334_v4  ;;  %v337_v7 = vld [vmem:[%s2645_s16 + $0x18] sm:$0xff]  ;;  %v338_v8 = vld [vmem:[%s2645_s16 + $0x20] sm:$0xff]  ;;  %v339_v9 = vld [vmem:[%s2645_s16 + $0x28] sm:$0xff] }
  0x1a   : > { %2043 = vmatmul.mubr.msk.f32.vlgmr.msra.gmra.mrb[0].mxu0 %vm358_vm1, %v335_v5  ;;  %v340_v10 = vld [vmem:[%s2645_s16 + $0x30] sm:$0xff]  ;;  %v341_v11 = vld [vmem:[%s2645_s16 + $0x38] sm:$0xff]  ;;  %v342_v12 = vld [vmem:[%s2645_s16 + $0x40] sm:$0xff] }
  0x1b   : > { %2045 = vmatprep.mubr.msk.f32.mxu0 %vm358_vm1, %v336_v6  ;;  %v343_v13 = vld [vmem:[%s2645_s16 + $0x48] sm:$0xff]  ;;  %v344_v14 = vld [vmem:[%s2645_s16 + $0x50] sm:$0xff]  ;;  %v345_v15 = vld [vmem:[%s2645_s16 + $0x58] sm:$0xff]  ;;  %2285 = vmatpush3.bf16.msra.mxu0 %v2282_v26 }
  0x1c   : > { %v346_v16 = vld [vmem:[%s2645_s16 + $0x60] sm:$0xff]  ;;  %v347_v17 = vld [vmem:[%s2645_s16 + $0x68] sm:$0xff]  ;;  %v348_v18 = vld [vmem:[%s2645_s16 + $0x70] sm:$0xff]  ;;  %2287 = vmatprep.subr.bf16.mxu0 %v2286_v28 }
  0x1d   : > { %v349_v19 = vld [vmem:[%s2645_s16 + $0x78] sm:$0xff]  ;;  %v849_v4 = vld [vmem:[%s3137_s5 + $0x40] sm:$0xff]  ;;  %v850_v5 = vld [vmem:[%s3137_s5 + $0x48] sm:$0xff]  ;;  %s1797_s16 = sshll.u32 %s324_s14, 7 }
  0x1e   : > { %2046 = vmatmul.mubr.msk.f32.gmra.mrb[2].mxu0 %vm358_vm1, %v337_v7  ;;  %v2298_v6 = vpack.c.bf16 %v850_v5, %v849_v4  ;;  %v851_v7 = vld [vmem:[%s3137_s5 + $0x50] sm:$0xff]  ;;  %s3062_s22 = scalar_lea.vmem [#allocation2], %s1797_s16  ;;  %s2471_s16 = sshll.u32 %s2531_s29, 4  ;;  %s2472_s16 = int_to_ptr.vmem [resolvable:$false] %s2471_s16 }
  0x1f   : > { %2048 = vmatprep.mubr.msk.f32.mxu0 %vm358_vm1, %v338_v8  ;;  %2289 = vmatpush3.bf16.msra.mxu0 %v2286_v28  ;;  %v852_v8 = vld [vmem:[%s3137_s5 + $0x58] sm:$0xff]  ;;  %s1731_s24 = sshll.u32 %s3062_s22, 4  ;;  %s2473_s17 = scalar_lea.vmem %s2472_s16, 4096  ;;  %s3085_s24 = int_to_ptr.vmem [resolvable:$true] %s1731_s24 }
  0x20   : > { %2291 = vmatprep.subr.bf16.mxu0 %v2290_v31  ;;  %s2467_s28 = scalar_lea.vmem %s3085_s24, 2048  ;;  %p2474_p0 = scmp.lt.s32.totalorder %s3085_s24, %s2472_s16 }
  0x21   : > { %p2468_p11 = scmp.ne.s32.totalorder %s3085_s24, %s2467_s28  ;;  %p2475_p1 = scmp.lt.s32.totalorder %s2473_s17, %s2467_s28 }
  0x22   : > { %2049 = vmatmul.mubr.msk.f32.gmra.mrb[4].mxu0 %vm358_vm1, %v339_v9  ;;  %v2302_v9 = vpack.c.bf16 %v852_v8, %v851_v7 }
  0x23   : > { %2051 = vmatprep.mubr.msk.f32.mxu0 %vm358_vm1, %v340_v10  ;;  %2293 = vmatpush3.bf16.msra.mxu0 %v2290_v31  ;;  %v853_v10 = vld [vmem:[%s3137_s5 + $0x60] sm:$0xff]  ;;  %p2469_p12 = pnand %p2468_p11, %p2622_p5  ;;  %p2476_p2 = por %p2475_p1, %p2474_p0 }
  0x24   : > { %2295 = vmatprep.subr.bf16.mxu0 %v2294_v3 }
  0x25   : > { %p2470_p13 = pneg %p2469_p12 }
  0x26   : > { %2052 = vmatmul.mubr.msk.f32.gmra.mrb[6].mxu0 %vm358_vm1, %v341_v11  ;;  %v854_v11 = vld [vmem:[%s3137_s5 + $0x68] sm:$0xff] }
  0x27   : > { %2054 = vmatprep.mubr.msk.f32.mxu0 %vm358_vm1, %v342_v12  ;;  %2297 = vmatpush3.bf16.msra.mxu0 %v2294_v3  ;;  %v2306_v12 = vpack.c.bf16 %v854_v11, %v853_v10  ;;  %p2477_p3 = pnand %p2476_p2, %p2470_p13 }
  0x28   : > { %2299 = vmatprep.subr.bf16.mxu0 %v2298_v6 }
  0x2a   : > { %2055 = vmatmul.mubr.msk.f32.gmra.mrb[8].mxu0 %vm358_vm1, %v343_v13  ;;  %v855_v13 = vld [vmem:[%s3137_s5 + $0x70] sm:$0xff] }
  0x2b   : > { %2057 = vmatprep.mubr.msk.f32.mxu0 %vm358_vm1, %v344_v14  ;;  %2301 = vmatpush3.bf16.msra.mxu0 %v2298_v6  ;;  %v856_v14 = vld [vmem:[%s3137_s5 + $0x78] sm:$0xff] }
  0x2c   : > { %2303 = vmatprep.subr.bf16.mxu0 %v2302_v9 }
  0x2e   : > { %2058 = vmatmul.mubr.msk.f32.gmra.mrb[10].mxu0 %vm358_vm1, %v345_v15  ;;  %v2310_v15 = vpack.c.bf16 %v856_v14, %v855_v13 }
  0x2f   : > { %2060 = vmatprep.mubr.msk.f32.mxu0 %vm358_vm1, %v346_v16  ;;  %2305 = vmatpush3.bf16.msra.mxu0 %v2302_v9  ;;  %v1836_v16 = vld [vmem:[%s3135_s3 + $0x20] sm:$0xff] }
  0x30   : > { %2307 = vmatprep.subr.bf16.mxu0 %v2306_v12 }
  0x32   : > { %2061 = vmatmul.mubr.msk.f32.gmra.mrb[12].mxu0 %vm358_vm1, %v347_v17  ;;  %v1837_v17 = vld [vmem:[%s3135_s3 + $0x28] sm:$0xff] }
  0x33   : > { %2063 = vmatprep.mubr.msk.f32.mxu0 %vm358_vm1, %v348_v18  ;;  %2309 = vmatpush3.bf16.msra.mxu0 %v2306_v12  ;;  %v1838_v18 = vld [vmem:[%s3135_s3 + $0x30] sm:$0xff] }
  0x34   : > { %2311 = vmatprep.subr.bf16.mxu0 %v2310_v15  ;;  %v2318_v21 = vpack.c.bf16 %v1839_v20, %v1838_v18 }
  0x36   : > { %2064 = vmatmul.mubr.msk.f32.gmra.mrb[14].mxu0 %vm358_vm1, %v349_v19  ;;  %v2314_v19 = vpack.c.bf16 %v1837_v17, %v1836_v16 }
  0x37   : > { %2313 = vmatpush3.bf16.msra.mxu0 %v2310_v15 }
  0x38   : > { %2315 = vmatprep.subr.bf16.mxu1 %v2314_v19 }
  0xed   : > { %v2044_v33 = vpop.f32.mrb[0].mxu0 }
  0xee   : > { %v477_v34 = vpop.f32.mrb[1].mxu0  ;;  %v2708_v36 = vadd.f32 %v2044_v33, %v1800_v32 }
  0xef   : > { %v2706_v35 = vadd.f32 %v1800_v32, %v477_v34 }
  0xf1   : > { %v2047_v37 = vpop.f32.mrb[2].mxu0  ;;  %2074 = vmatprep.mubr.msk.f32.mxu1 %vm567_vm2, %v2706_v35 }
  0xf2   : > { %v487_v38 = vpop.f32.mrb[3].mxu0  ;;  %2075 = vmatmul.mubr.msk.f32.vlgmr.msra.gmra.mrb[0].mxu1 %vm567_vm2, %v2708_v36  ;;  %v2716_v40 = vadd.f32 %v2047_v37, %v1800_v32 }
  0xf3   : > { %v2714_v39 = vadd.f32 %v1800_v32, %v487_v38  ;;  %2317 = vmatpush3.bf16.msra.mxu1 %v2314_v19 }
  0xf4   : > { %2319 = vmatprep.subr.bf16.mxu1 %v2318_v21 }
  0xf5   : > { %v2050_v41 = vpop.f32.mrb[4].mxu0  ;;  %2077 = vmatprep.mubr.msk.f32.mxu1 %vm567_vm2, %v2714_v39 }
  0xf6   : > { %v497_v42 = vpop.f32.mrb[5].mxu0  ;;  %2078 = vmatmul.mubr.msk.f32.gmra.mrb[2].mxu1 %vm567_vm2, %v2716_v40  ;;  %v2724_v44 = vadd.f32 %v2050_v41, %v1800_v32 }
  0xf7   : > { %v2722_v43 = vadd.f32 %v1800_v32, %v497_v42  ;;  %2321 = vmatpush3.bf16.msra.mxu1 %v2318_v21 }
  0xf9   : > { %v2053_v45 = vpop.f32.mrb[6].mxu0  ;;  %2080 = vmatprep.mubr.msk.f32.mxu1 %vm567_vm2, %v2722_v43 }
  0xfa   : > { %v507_v46 = vpop.f32.mrb[7].mxu0  ;;  %2081 = vmatmul.mubr.msk.f32.gmra.mrb[4].mxu1 %vm567_vm2, %v2724_v44  ;;  %v2732_v48 = vadd.f32 %v2053_v45, %v1800_v32 }
  0xfb   : > { %v2730_v47 = vadd.f32 %v1800_v32, %v507_v46 }
  0xfd   : > { %v2056_v49 = vpop.f32.mrb[8].mxu0  ;;  %2083 = vmatprep.mubr.msk.f32.mxu1 %vm567_vm2, %v2730_v47 }
  0xfe   : > { %v517_v50 = vpop.f32.mrb[9].mxu0  ;;  %2084 = vmatmul.mubr.msk.f32.gmra.mrb[6].mxu1 %vm567_vm2, %v2732_v48  ;;  %v2740_v52 = vadd.f32 %v2056_v49, %v1800_v32 }
  0xff   : > { %v2738_v51 = vadd.f32 %v1800_v32, %v517_v50 }
 0x101   : > { %v2059_v53 = vpop.f32.mrb[10].mxu0  ;;  %2086 = vmatprep.mubr.msk.f32.mxu1 %vm567_vm2, %v2738_v51 }
 0x102   : > { %v527_v54 = vpop.f32.mrb[11].mxu0  ;;  %2087 = vmatmul.mubr.msk.f32.gmra.mrb[8].mxu1 %vm567_vm2, %v2740_v52  ;;  %v2748_v56 = vadd.f32 %v2059_v53, %v1800_v32 }
 0x103   : > { %v2746_v55 = vadd.f32 %v1800_v32, %v527_v54 }
 0x105   : > { %v2062_v57 = vpop.f32.mrb[12].mxu0  ;;  %2089 = vmatprep.mubr.msk.f32.mxu1 %vm567_vm2, %v2746_v55 }
 0x106   : > { %v537_v58 = vpop.f32.mrb[13].mxu0  ;;  %2090 = vmatmul.mubr.msk.f32.gmra.mrb[10].mxu1 %vm567_vm2, %v2748_v56  ;;  %v2756_v60 = vadd.f32 %v2062_v57, %v1800_v32 }
 0x107   : > { %v2754_v59 = vadd.f32 %v1800_v32, %v537_v58 }
 0x109   : > { %v2065_v61 = vpop.f32.mrb[14].mxu0  ;;  %2092 = vmatprep.mubr.msk.f32.mxu1 %vm567_vm2, %v2754_v59 }
 0x10a   : > { %v547_v62 = vpop.f32.mrb[15].mxu0  ;;  %2093 = vmatmul.mubr.msk.f32.gmra.mrb[12].mxu1 %vm567_vm2, %v2756_v60  ;;  %v2764_v0 = vadd.f32 %v2065_v61, %v1800_v32 }
 0x10b   : > { %v2762_v63 = vadd.f32 %v1800_v32, %v547_v62 }
 0x10d   : > { %2095 = vmatprep.mubr.msk.f32.mxu1 %vm567_vm2, %v2762_v63 }
 0x10e   : > { %2096 = vmatmul.mubr.msk.f32.gmra.mrb[14].mxu1 %vm567_vm2, %v2764_v0 }
 0x1c5   : > { %v2076_v23 = vpop.f32.mrb[0].mxu1 }
 0x1c6   : > { %v688_v24 = vadd.f32 %v2076_v23, %v2815_v22  ;;  %v682_v25 = vpop.f32.mrb[1].mxu1 }
 0x1c7   : > { %v683_v26 = vadd.f32 %v2815_v22, %v682_v25 }
 0x1c8   : > { %v778_v27 = vmul.f32 0.70710677, %v688_v24  ;;  %v762_v7 = vmul.f32 0.5, %v688_v24 }
 0x1c9   : > { %v777_v28 = vmul.f32 0.70710677, %v683_v26  ;;  %v2079_v29 = vpop.f32.mrb[2].mxu1  ;;  %v761_v3 = vmul.f32 0.5, %v683_v26 }
 0x1ca   : > { %2403 = verf.f32 %v778_v27  ;;  %v698_v30 = vadd.f32 %v2079_v29, %v2815_v22  ;;  %v692_v31 = vpop.f32.mrb[3].mxu1 }
 0x1cb   : > { %2405 = verf.f32 %v777_v28  ;;  %v693_v32 = vadd.f32 %v2815_v22, %v692_v31 }
 0x1cc   : > { %v780_v33 = vmul.f32 0.70710677, %v698_v30  ;;  %v764_v21 = vmul.f32 0.5, %v698_v30 }
 0x1cd   : > { %v779_v34 = vmul.f32 0.70710677, %v693_v32  ;;  %v2082_v37 = vpop.f32.mrb[4].mxu1  ;;  %v763_v17 = vmul.f32 0.5, %v693_v32 }
 0x1ce   : > { %2407 = verf.f32 %v780_v33  ;;  %v708_v38 = vadd.f32 %v2082_v37, %v2815_v22  ;;  %v702_v41 = vpop.f32.mrb[5].mxu1 }
 0x1cf   : > { %2409 = verf.f32 %v779_v34  ;;  %v703_v42 = vadd.f32 %v2815_v22, %v702_v41 }
 0x1d0   : > { %v782_v45 = vmul.f32 0.70710677, %v708_v38  ;;  %v766_v30 = vmul.f32 0.5, %v708_v38 }
 0x1d1   : > { %v781_v46 = vmul.f32 0.70710677, %v703_v42  ;;  %v2085_v49 = vpop.f32.mrb[6].mxu1  ;;  %v765_v33 = vmul.f32 0.5, %v703_v42 }
 0x1d2   : > { %2411 = verf.f32 %v782_v45  ;;  %v2824_v50 = vadd.f32 %v2085_v49, %v2815_v22  ;;  %v712_v53 = vpop.f32.mrb[7].mxu1 }
 0x1d3   : > { %2413 = verf.f32 %v781_v46  ;;  %v713_v54 = vadd.f32 %v2815_v22, %v712_v53 }
 0x1d4   : > { %v2404_v57 = vpop.eup %2403  ;;  %v784_v58 = vmul.f32 0.70710677, %v2824_v50  ;;  %v768_v38 = vmul.f32 0.5, %v2824_v50 }
 0x1d5   : > { %v2406_v61 = vpop.eup %2405  ;;  %v810_v62 = vadd.f32 1.0, %v2404_v57  ;;  %v783_v1 = vmul.f32 0.70710677, %v713_v54  ;;  %v2088_v2 = vpop.f32.mrb[8].mxu1  ;;  %v767_v42 = vmul.f32 0.5, %v713_v54 }
 0x1d6   : > { %v809_v4 = vadd.f32 1.0, %v2406_v61  ;;  %2415 = verf.f32 %v784_v58  ;;  %v2829_v5 = vadd.f32 %v2088_v2, %v2815_v22  ;;  %v722_v6 = vpop.f32.mrb[9].mxu1 }
 0x1d7   : > { %2417 = verf.f32 %v783_v1  ;;  %v723_v8 = vadd.f32 %v2815_v22, %v722_v6  ;;  %v826_v13 = vmul.f32 %v810_v62, %v762_v7 }
 0x1d8   : > { %v2408_v9 = vpop.eup %2407  ;;  %v786_v10 = vmul.f32 0.70710677, %v2829_v5  ;;  %v825_v11 = vmul.f32 %v809_v4, %v761_v3 }
 0x1d9   : > { %v2410_v12 = vpop.eup %2409  ;;  %v812_v14 = vadd.f32 1.0, %v2408_v9  ;;  %v785_v15 = vmul.f32 0.70710677, %v723_v8  ;;  %v2091_v16 = vpop.f32.mrb[10].mxu1  ;;  %v769_v54 = vmul.f32 0.5, %v723_v8 }
 0x1da   : > { %v811_v18 = vadd.f32 1.0, %v2410_v12  ;;  %2419 = verf.f32 %v786_v10  ;;  %v2834_v19 = vadd.f32 %v2091_v16, %v2815_v22  ;;  %v732_v20 = vpop.f32.mrb[11].mxu1  ;;  %2130 = vmatprep.mubr.f32.mxu0 %v825_v11  ;;  %v770_v16 = vmul.f32 0.5, %v2829_v5 }
 0x1db   : > { %2421 = verf.f32 %v785_v15  ;;  %v733_v23 = vadd.f32 %v2815_v22, %v732_v20  ;;  %2131 = vmatmul.mubr.f32.vlgmr.msra.gmra.mrb[16].mxu0 %v826_v13  ;;  %v828_v32 = vmul.f32 %v812_v14, %v764_v21 }
 0x1dc   : > { %v2412_v24 = vpop.eup %2411  ;;  %v788_v25 = vmul.f32 0.70710677, %v2834_v19  ;;  %v827_v26 = vmul.f32 %v811_v18, %v763_v17 }
 0x1dd   : > { %v2414_v27 = vpop.eup %2413  ;;  %v814_v28 = vadd.f32 1.0, %v2412_v24  ;;  %v787_v29 = vmul.f32 0.70710677, %v733_v23  ;;  %v2094_v31 = vpop.f32.mrb[12].mxu1  ;;  %v771_v21 = vmul.f32 0.5, %v733_v23 }
 0x1de   : > { %v813_v34 = vadd.f32 1.0, %v2414_v27  ;;  %2423 = verf.f32 %v788_v25  ;;  %v748_v37 = vadd.f32 %v2094_v31, %v2815_v22  ;;  %v742_v41 = vpop.f32.mrb[13].mxu1  ;;  %2133 = vmatprep.mubr.f32.mxu0 %v827_v26  ;;  %v772_v25 = vmul.f32 0.5, %v2834_v19 }
 0x1df   : > { %2425 = verf.f32 %v787_v29  ;;  %v743_v45 = vadd.f32 %v2815_v22, %v742_v41  ;;  %2134 = vmatmul.mubr.f32.gmra.mrb[18].mxu0 %v828_v32  ;;  %v830_v1 = vmul.f32 %v814_v28, %v766_v30 }
 0x1e0   : > { %v2416_v46 = vpop.eup %2415  ;;  %v790_v49 = vmul.f32 0.70710677, %v748_v37  ;;  %v829_v53 = vmul.f32 %v813_v34, %v765_v33  ;;  %v774_v32 = vmul.f32 0.5, %v748_v37  ;;  %v1859_v37 = vld [vmem:[%s3137_s5 + $0x88] sm:$0xff] }
 0x1e1   : > { %v2418_v57 = vpop.eup %2417  ;;  %v816_v58 = vadd.f32 1.0, %v2416_v46  ;;  %v789_v61 = vmul.f32 0.70710677, %v743_v45  ;;  %v2097_v62 = vpop.f32.mrb[14].mxu1  ;;  %v773_v31 = vmul.f32 0.5, %v743_v45  ;;  %v1858_v45 = vld [vmem:[%s3137_s5 + $0x80] sm:$0xff] }
 0x1e2   : > { %v815_v2 = vadd.f32 1.0, %v2418_v57  ;;  %2427 = verf.f32 %v790_v49  ;;  %v758_v3 = vadd.f32 %v2097_v62, %v2815_v22  ;;  %v752_v4 = vpop.f32.mrb[15].mxu1  ;;  %2136 = vmatprep.mubr.f32.mxu0 %v829_v53  ;;  %v1861_v62 = vld [vmem:[%s3137_s5 + $0x98] sm:$0xff] }
 0x1e3   : > { %2429 = verf.f32 %v789_v61  ;;  %v753_v6 = vadd.f32 %v2815_v22, %v752_v4  ;;  %2137 = vmatmul.mubr.f32.gmra.mrb[20].mxu0 %v830_v1  ;;  %v832_v14 = vmul.f32 %v816_v58, %v768_v38  ;;  %v1860_v58 = vld [vmem:[%s3137_s5 + $0x90] sm:$0xff]  ;;  %v2322_v61 = vpack.c.bf16 %v1859_v37, %v1858_v45  ;;  %v1835_v4 = vld [vmem:[%s3138_s6] ss:$0 sm:$0xff]  ;;  %v1869_v37 = vld [vmem:[%s3137_s5 + $0xd8] sm:$0xff] }
 0x1e4   : > { %v2420_v7 = vpop.eup %2419  ;;  %v792_v9 = vmul.f32 0.70710677, %v758_v3  ;;  %v831_v10 = vmul.f32 %v815_v2, %v767_v42  ;;  %v776_v19 = vmul.f32 0.5, %v758_v3  ;;  %v2326_v1 = vpack.c.bf16 %v1861_v62, %v1860_v58  ;;  %v1862_v42 = vld [vmem:[%s3137_s5 + $0xa0] sm:$0xff]  ;;  %v1863_v2 = vld [vmem:[%s3137_s5 + $0xa8] sm:$0xff]  ;;  %v1868_v45 = vld [vmem:[%s3137_s5 + $0xd0] sm:$0xff] }
 0x1e5   : > { %v2422_v11 = vpop.eup %2421  ;;  %v818_v12 = vadd.f32 1.0, %v2420_v7  ;;  %v791_v13 = vmul.f32 0.70710677, %v753_v6  ;;  %v775_v46 = vmul.f32 0.5, %v753_v6  ;;  %2323 = vmatprep.subr.bf16.mxu0 %v2322_v61  ;;  %v2330_v3 = vpack.c.bf16 %v1863_v2, %v1862_v42  ;;  %v1871_v62 = vld [vmem:[%s3137_s5 + $0xe8] sm:$0xff]  ;;  %v1872_v42 = vld [vmem:[%s3137_s5 + $0xf0] sm:$0xff] }
 0x1e6   : > { %v817_v15 = vadd.f32 1.0, %v2422_v11  ;;  %2431 = verf.f32 %v792_v9  ;;  %2139 = vmatprep.mubr.f32.mxu0 %v831_v10  ;;  %2325 = vmatpush3.bf16.msra.mxu0 %v2322_v61  ;;  %v2342_v58 = vpack.c.bf16 %v1869_v37, %v1868_v45  ;;  %v1870_v61 = vld [vmem:[%s3137_s5 + $0xe0] sm:$0xff]  ;;  %v1873_v2 = vld [vmem:[%s3137_s5 + $0xf8] sm:$0xff] }
 0x1e7   : > { %2433 = verf.f32 %v791_v13  ;;  %2140 = vmatmul.mubr.f32.gmra.mrb[22].mxu0 %v832_v14  ;;  %v834_v20 = vmul.f32 %v818_v12, %v770_v16  ;;  %2327 = vmatprep.subr.bf16.mxu0 %v2326_v1 }
 0x1e8   : > { %v2424_v50 = vpop.eup %2423  ;;  %v833_v17 = vmul.f32 %v817_v15, %v769_v54 }
 0x1e9   : > { %v2426_v18 = vpop.eup %2425  ;;  %v820_v22 = vadd.f32 1.0, %v2424_v50 }
 0x1ea   : > { %v819_v24 = vadd.f32 1.0, %v2426_v18  ;;  %2142 = vmatprep.mubr.f32.mxu0 %v833_v17  ;;  %2329 = vmatpush3.bf16.msra.mxu0 %v2326_v1  ;;  %v2346_v1 = vpack.c.bf16 %v1871_v62, %v1870_v61 }
 0x1eb   : > { %2143 = vmatmul.mubr.f32.gmra.mrb[24].mxu0 %v834_v20  ;;  %v836_v29 = vmul.f32 %v820_v22, %v772_v25  ;;  %2331 = vmatprep.subr.bf16.mxu0 %v2330_v3 }
 0x1ec   : > { %v2428_v26 = vpop.eup %2427  ;;  %v835_v8 = vmul.f32 %v819_v24, %v771_v21 }
 0x1ed   : > { %v2430_v27 = vpop.eup %2429  ;;  %v822_v28 = vadd.f32 1.0, %v2428_v26 }
 0x1ee   : > { %v821_v5 = vadd.f32 1.0, %v2430_v27  ;;  %2145 = vmatprep.mubr.f32.mxu0 %v835_v8  ;;  %2333 = vmatpush3.bf16.msra.mxu0 %v2330_v3  ;;  %v2350_v3 = vpack.c.bf16 %v1873_v2, %v1872_v42 }
 0x1ef   : > { %2146 = vmatmul.mubr.f32.gmra.mrb[26].mxu0 %v836_v29  ;;  %v838_v23 = vmul.f32 %v822_v28, %v774_v32 }
 0x1f0   : > { %v2432_v33 = vpop.eup %2431  ;;  %v837_v34 = vmul.f32 %v821_v5, %v773_v31 }
 0x1f1   : > { %v2434_v41 = vpop.eup %2433  ;;  %v824_v30 = vadd.f32 1.0, %v2432_v33 }
 0x1f2   : > { %v823_v49 = vadd.f32 1.0, %v2434_v41  ;;  %2148 = vmatprep.mubr.f32.mxu0 %v837_v34 }
 0x1f3   : > { %2149 = vmatmul.mubr.f32.gmra.mrb[28].mxu0 %v838_v23  ;;  %v840_v57 = vmul.f32 %v824_v30, %v776_v19 }
 0x1f4   : > { %v839_v53 = vmul.f32 %v823_v49, %v775_v46 }
 0x1f6   : > { %2151 = vmatprep.mubr.f32.mxu0 %v839_v53 }
 0x1f7   : > { %2152 = vmatmul.mubr.f32.gmra.mrb[30].mxu0 %v840_v57 }
 0x2ae   : > { %v2132_v38 = vpop.f32.mrb[16].mxu0 }
 0x2af   : > { %v936_v6 = vadd.f32 %v2132_v38, %v1835_v4  ;;  %v930_v7 = vpop.f32.mrb[17].mxu0  ;;  %v1498_v38 = vld [vmem:[%s3139_s7 + $0x8] sm:$0xff] }
 0x2b0   : > { %v931_v9 = vadd.f32 %v1835_v4, %v930_v7 }
 0x2b1   : > { %v2870_v12 = vadd.f32 %v936_v6, %v2708_v36  ;;  %v1499_v6 = vld [vmem:[%s3139_s7 + $0x10] sm:$0xff] }
 0x2b2   : > { %v2867_v10 = vadd.f32 %v931_v9, %v2706_v35  ;;  %v2135_v11 = vpop.f32.mrb[18].mxu0  ;;  %v1500_v9 = vld [vmem:[%s3139_s7 + $0x18] sm:$0xff] }
 0x2b3   : > { %v946_v13 = vadd.f32 %v2135_v11, %v1835_v4  ;;  %v940_v14 = vpop.f32.mrb[19].mxu0  ;;  %v2358_v11 = vpack.c.bf16 %v1500_v9, %v1499_v6 }
 0x2b4   : > { %v941_v54 = vadd.f32 %v1835_v4, %v940_v14  ;;  %2162 = vmatprep.mubr.msk.f32.mxu1 %vm567_vm2, %v2867_v10 }
 0x2b5   : > { %2163 = vmatmul.mubr.msk.f32.vlgmr.msra.gmra.mrb[16].mxu1 %vm567_vm2, %v2870_v12  ;;  %v2880_v35 = vadd.f32 %v946_v13, %v2716_v40  ;;  %v2991_v13 = vld [vmem:[%s3136_s4 + $0x1] ss:$0 sm:$0xff] }
 0x2b6   : > { %v2877_v15 = vadd.f32 %v941_v54, %v2714_v39  ;;  %v2138_v16 = vpop.f32.mrb[20].mxu0 }
 0x2b7   : > { %v956_v50 = vadd.f32 %v2138_v16, %v1835_v4  ;;  %v950_v17 = vpop.f32.mrb[21].mxu0 }
 0x2b8   : > { %v951_v36 = vadd.f32 %v1835_v4, %v950_v17  ;;  %2165 = vmatprep.mubr.msk.f32.mxu1 %vm567_vm2, %v2877_v15 }
 0x2b9   : > { %2166 = vmatmul.mubr.msk.f32.gmra.mrb[18].mxu1 %vm567_vm2, %v2880_v35  ;;  %v2890_v39 = vadd.f32 %v956_v50, %v2724_v44 }
 0x2ba   : > { %v2887_v18 = vadd.f32 %v951_v36, %v2722_v43  ;;  %v2141_v22 = vpop.f32.mrb[22].mxu0 }
 0x2bb   : > { %v966_v20 = vadd.f32 %v2141_v22, %v1835_v4  ;;  %v960_v21 = vpop.f32.mrb[23].mxu0 }
 0x2bc   : > { %v961_v40 = vadd.f32 %v1835_v4, %v960_v21  ;;  %2168 = vmatprep.mubr.msk.f32.mxu1 %vm567_vm2, %v2887_v18 }
 0x2bd   : > { %2169 = vmatmul.mubr.msk.f32.gmra.mrb[20].mxu1 %vm567_vm2, %v2890_v39  ;;  %v2900_v43 = vadd.f32 %v966_v20, %v2732_v48 }
 0x2be   : > { %v2897_v24 = vadd.f32 %v961_v40, %v2730_v47  ;;  %v2144_v25 = vpop.f32.mrb[24].mxu0 }
 0x2bf   : > { %v976_v26 = vadd.f32 %v2144_v25, %v1835_v4  ;;  %v970_v8 = vpop.f32.mrb[25].mxu0 }
 0x2c0   : > { %v971_v44 = vadd.f32 %v1835_v4, %v970_v8  ;;  %2171 = vmatprep.mubr.msk.f32.mxu1 %vm567_vm2, %v2897_v24 }
 0x2c1   : > { %2172 = vmatmul.mubr.msk.f32.gmra.mrb[22].mxu1 %vm567_vm2, %v2900_v43  ;;  %v2910_v47 = vadd.f32 %v976_v26, %v2740_v52 }
 0x2c2   : > { %v2907_v27 = vadd.f32 %v971_v44, %v2738_v51  ;;  %v2147_v28 = vpop.f32.mrb[26].mxu0 }
 0x2c3   : > { %v986_v29 = vadd.f32 %v2147_v28, %v1835_v4  ;;  %v980_v31 = vpop.f32.mrb[27].mxu0 }
 0x2c4   : > { %v981_v48 = vadd.f32 %v1835_v4, %v980_v31  ;;  %2174 = vmatprep.mubr.msk.f32.mxu1 %vm567_vm2, %v2907_v27 }
 0x2c5   : > { %2175 = vmatmul.mubr.msk.f32.gmra.mrb[24].mxu1 %vm567_vm2, %v2910_v47  ;;  %v2920_v51 = vadd.f32 %v986_v29, %v2748_v56 }
 0x2c6   : > { %v2917_v5 = vadd.f32 %v981_v48, %v2746_v55  ;;  %v2150_v32 = vpop.f32.mrb[28].mxu0 }
 0x2c7   : > { %v996_v33 = vadd.f32 %v2150_v32, %v1835_v4  ;;  %v990_v34 = vpop.f32.mrb[29].mxu0 }
 0x2c8   : > { %v991_v52 = vadd.f32 %v1835_v4, %v990_v34  ;;  %2177 = vmatprep.mubr.msk.f32.mxu1 %vm567_vm2, %v2917_v5 }
 0x2c9   : > { %2178 = vmatmul.mubr.msk.f32.gmra.mrb[26].mxu1 %vm567_vm2, %v2920_v51  ;;  %v2930_v55 = vadd.f32 %v996_v33, %v2756_v60  ;;  %v1865_v60 = vld [vmem:[%s3137_s5 + $0xb8] sm:$0xff] }
 0x2ca   : > { %v2927_v41 = vadd.f32 %v991_v52, %v2754_v59  ;;  %v2153_v30 = vpop.f32.mrb[30].mxu0  ;;  %v1864_v59 = vld [vmem:[%s3137_s5 + $0xb0] sm:$0xff] }
 0x2cb   : > { %v1006_v23 = vadd.f32 %v2153_v30, %v1835_v4  ;;  %v1000_v46 = vpop.f32.mrb[31].mxu0  ;;  %v2334_v53 = vpack.c.bf16 %v1865_v60, %v1864_v59 }
 0x2cc   : > { %v1001_v56 = vadd.f32 %v1835_v4, %v1000_v46  ;;  %2180 = vmatprep.mubr.msk.f32.mxu1 %vm567_vm2, %v2927_v41  ;;  %v1497_v4 = vld [vmem:[%s3139_s7] sm:$0xff] }
 0x2cd   : > { %2181 = vmatmul.mubr.msk.f32.gmra.mrb[28].mxu1 %vm567_vm2, %v2930_v55  ;;  %v2940_v19 = vadd.f32 %v1006_v23, %v2764_v0  ;;  %2335 = vmatprep.subr.bf16.mxu0 %v2334_v53  ;;  %v1867_v0 = vld [vmem:[%s3137_s5 + $0xc8] sm:$0xff]  ;;  %v2354_v7 = vpack.c.bf16 %v1498_v38, %v1497_v4 }
 0x2ce   : > { %v2937_v49 = vadd.f32 %v1001_v56, %v2762_v63  ;;  %2337 = vmatpush3.bf16.msra.mxu0 %v2334_v53  ;;  %v1866_v63 = vld [vmem:[%s3137_s5 + $0xc0] sm:$0xff] }
 0x2cf   : > { %v2338_v57 = vpack.c.bf16 %v1867_v0, %v1866_v63  ;;  %2355 = vmatprep.subr.bf16.mxu1 %v2354_v7 }
 0x2d0   : > { %2183 = vmatprep.mubr.msk.f32.mxu1 %vm567_vm2, %v2937_v49  ;;  %2357 = vmatpush3.bf16.msra.mxu1 %v2354_v7 }
 0x2d1   : > { %2184 = vmatmul.mubr.msk.f32.gmra.mrb[30].mxu1 %vm567_vm2, %v2940_v19  ;;  %2339 = vmatprep.subr.bf16.mxu0 %v2338_v57 }
 0x2d2   : > { %2341 = vmatpush3.bf16.msra.mxu0 %v2338_v57  ;;  %2359 = vmatprep.subr.bf16.mxu1 %v2358_v11 }
 0x2d3   : > { %2343 = vmatprep.subr.bf16.mxu0 %v2342_v58 }
 0x2d4   : > { %2361 = vmatpush3.bf16.msra.mxu1 %v2358_v11 }
 0x2d6   : > { %2345 = vmatpush3.bf16.msra.mxu0 %v2342_v58 }
 0x2d7   : > { %2347 = vmatprep.subr.bf16.mxu0 %v2346_v1 }
 0x2da   : > { %2349 = vmatpush3.bf16.msra.mxu0 %v2346_v1 }
 0x2db   : > { %2351 = vmatprep.subr.bf16.mxu0 %v2350_v3 }
 0x2de   : > { %2353 = vmatpush3.bf16.msra.mxu0 %v2350_v3 }
 0x388   : > { %v2164_v14 = vpop.f32.mrb[16].mxu1 }
 0x389   : > { %v1158_v54 = vadd.f32 %v2164_v14, %v2991_v13  ;;  %v1152_v16 = vpop.f32.mrb[17].mxu1 }
 0x38a   : > { %v1153_v50 = vadd.f32 %v2991_v13, %v1152_v16 }
 0x38b   : > { %v1248_v17 = vmul.f32 0.70710677, %v1158_v54  ;;  %v1232_v45 = vmul.f32 0.5, %v1158_v54 }
 0x38c   : > { %v1247_v36 = vmul.f32 0.70710677, %v1153_v50  ;;  %v2167_v22 = vpop.f32.mrb[18].mxu1  ;;  %v1231_v53 = vmul.f32 0.5, %v1153_v50 }
 0x38d   : > { %2435 = verf.f32 %v1248_v17  ;;  %v1168_v20 = vadd.f32 %v2167_v22, %v2991_v13  ;;  %v1162_v21 = vpop.f32.mrb[19].mxu1 }
 0x38e   : > { %2437 = verf.f32 %v1247_v36  ;;  %v1163_v40 = vadd.f32 %v2991_v13, %v1162_v21 }
 0x38f   : > { %v1250_v25 = vmul.f32 0.70710677, %v1168_v20  ;;  %v1234_v11 = vmul.f32 0.5, %v1168_v20 }
 0x390   : > { %v1249_v26 = vmul.f32 0.70710677, %v1163_v40  ;;  %v2170_v8 = vpop.f32.mrb[20].mxu1  ;;  %v1233_v38 = vmul.f32 0.5, %v1163_v40 }
 0x391   : > { %2439 = verf.f32 %v1250_v25  ;;  %v1178_v44 = vadd.f32 %v2170_v8, %v2991_v13  ;;  %v1172_v28 = vpop.f32.mrb[21].mxu1 }
 0x392   : > { %2441 = verf.f32 %v1249_v26  ;;  %v1173_v29 = vadd.f32 %v2991_v13, %v1172_v28 }
 0x393   : > { %v1252_v31 = vmul.f32 0.70710677, %v1178_v44  ;;  %v1236_v20 = vmul.f32 0.5, %v1178_v44 }
 0x394   : > { %v1251_v48 = vmul.f32 0.70710677, %v1173_v29  ;;  %v2173_v32 = vpop.f32.mrb[22].mxu1  ;;  %v1235_v25 = vmul.f32 0.5, %v1173_v29 }
 0x395   : > { %2443 = verf.f32 %v1252_v31  ;;  %v3000_v33 = vadd.f32 %v2173_v32, %v2991_v13  ;;  %v1182_v34 = vpop.f32.mrb[23].mxu1 }
 0x396   : > { %2445 = verf.f32 %v1251_v48  ;;  %v1183_v52 = vadd.f32 %v2991_v13, %v1182_v34 }
 0x397   : > { %v2436_v30 = vpop.eup %2435  ;;  %v1254_v23 = vmul.f32 0.70710677, %v3000_v33  ;;  %v1238_v44 = vmul.f32 0.5, %v3000_v33 }
 0x398   : > { %v2438_v46 = vpop.eup %2437  ;;  %v1280_v56 = vadd.f32 1.0, %v2436_v30  ;;  %v1253_v59 = vmul.f32 0.70710677, %v1183_v52  ;;  %v2176_v60 = vpop.f32.mrb[24].mxu1  ;;  %v1237_v29 = vmul.f32 0.5, %v1183_v52 }
 0x399   : > { %v1279_v63 = vadd.f32 1.0, %v2438_v46  ;;  %2447 = verf.f32 %v1254_v23  ;;  %v3005_v0 = vadd.f32 %v2176_v60, %v2991_v13  ;;  %v1192_v57 = vpop.f32.mrb[25].mxu1 }
 0x39a   : > { %2449 = verf.f32 %v1253_v59  ;;  %v1193_v37 = vadd.f32 %v2991_v13, %v1192_v57  ;;  %v1296_v42 = vmul.f32 %v1280_v56, %v1232_v45 }
 0x39b   : > { %v2440_v58 = vpop.eup %2439  ;;  %v1256_v61 = vmul.f32 0.70710677, %v3005_v0  ;;  %v1295_v62 = vmul.f32 %v1279_v63, %v1231_v53 }
 0x39c   : > { %v2442_v1 = vpop.eup %2441  ;;  %v1282_v2 = vadd.f32 1.0, %v2440_v58  ;;  %v1255_v3 = vmul.f32 0.70710677, %v1193_v37  ;;  %v2179_v4 = vpop.f32.mrb[26].mxu1  ;;  %v1239_v52 = vmul.f32 0.5, %v1193_v37 }
 0x39d   : > { %v1281_v6 = vadd.f32 1.0, %v2442_v1  ;;  %2451 = verf.f32 %v1256_v61  ;;  %v3010_v7 = vadd.f32 %v2179_v4, %v2991_v13  ;;  %v1202_v9 = vpop.f32.mrb[27].mxu1  ;;  %2218 = vmatprep.mubr.f32.mxu0 %v1295_v62  ;;  %v1240_v4 = vmul.f32 0.5, %v3005_v0 }
 0x39e   : > { %2453 = verf.f32 %v1255_v3  ;;  %v1203_v14 = vadd.f32 %v2991_v13, %v1202_v9  ;;  %2219 = vmatmul.mubr.f32.vlgmr.msra.gmra.mrb[32].mxu0 %v1296_v42  ;;  %v1298_v40 = vmul.f32 %v1282_v2, %v1234_v11 }
 0x39f   : > { %v2444_v54 = vpop.eup %2443  ;;  %v1258_v16 = vmul.f32 0.70710677, %v3010_v7  ;;  %v1297_v50 = vmul.f32 %v1281_v6, %v1233_v38 }
 0x3a0   : > { %v2446_v17 = vpop.eup %2445  ;;  %v1284_v36 = vadd.f32 1.0, %v2444_v54  ;;  %v1257_v22 = vmul.f32 0.70710677, %v1203_v14  ;;  %v2182_v21 = vpop.f32.mrb[28].mxu1  ;;  %v1241_v11 = vmul.f32 0.5, %v1203_v14 }
 0x3a1   : > { %v1283_v26 = vadd.f32 1.0, %v2446_v17  ;;  %2455 = verf.f32 %v1258_v16  ;;  %v1218_v8 = vadd.f32 %v2182_v21, %v2991_v13  ;;  %v1212_v28 = vpop.f32.mrb[29].mxu1  ;;  %2221 = vmatprep.mubr.f32.mxu0 %v1297_v50  ;;  %v1242_v16 = vmul.f32 0.5, %v3010_v7 }
 0x3a2   : > { %2457 = verf.f32 %v1257_v22  ;;  %v1213_v31 = vadd.f32 %v2991_v13, %v1212_v28  ;;  %2222 = vmatmul.mubr.f32.gmra.mrb[34].mxu0 %v1298_v40  ;;  %v1300_v59 = vmul.f32 %v1284_v36, %v1236_v20 }
 0x3a3   : > { %v2448_v48 = vpop.eup %2447  ;;  %v1260_v32 = vmul.f32 0.70710677, %v1218_v8  ;;  %v1299_v34 = vmul.f32 %v1283_v26, %v1235_v25  ;;  %v1244_v40 = vmul.f32 0.5, %v1218_v8 }
 0x3a4   : > { %v2450_v30 = vpop.eup %2449  ;;  %v1286_v23 = vadd.f32 1.0, %v2448_v48  ;;  %v1259_v46 = vmul.f32 0.70710677, %v1213_v31  ;;  %v2185_v56 = vpop.f32.mrb[30].mxu1  ;;  %v1243_v21 = vmul.f32 0.5, %v1213_v31 }
 0x3a5   : > { %v1285_v60 = vadd.f32 1.0, %v2450_v30  ;;  %2459 = verf.f32 %v1260_v32  ;;  %v1228_v53 = vadd.f32 %v2185_v56, %v2991_v13  ;;  %v1222_v63 = vpop.f32.mrb[31].mxu1  ;;  %2224 = vmatprep.mubr.f32.mxu0 %v1299_v34  ;;  %v1875_v31 = vld [vmem:[%s3138_s6 + $0x1] ss:$0 sm:$0xff] }
 0x3a6   : > { %2461 = verf.f32 %v1259_v46  ;;  %v1223_v57 = vadd.f32 %v2991_v13, %v1222_v63  ;;  %2225 = vmatmul.mubr.f32.gmra.mrb[36].mxu0 %v1300_v59  ;;  %v1302_v2 = vmul.f32 %v1286_v23, %v1238_v44 }
 0x3a7   : > { %v2452_v45 = vpop.eup %2451  ;;  %v1262_v58 = vmul.f32 0.70710677, %v1228_v53  ;;  %v1301_v61 = vmul.f32 %v1285_v60, %v1237_v29  ;;  %v1246_v7 = vmul.f32 0.5, %v1228_v53 }
 0x3a8   : > { %v2454_v62 = vpop.eup %2453  ;;  %v1288_v1 = vadd.f32 1.0, %v2452_v45  ;;  %v1261_v42 = vmul.f32 0.70710677, %v1223_v57  ;;  %v1245_v48 = vmul.f32 0.5, %v1223_v57 }
 0x3a9   : > { %v1287_v3 = vadd.f32 1.0, %v2454_v62  ;;  %2463 = verf.f32 %v1262_v58  ;;  %2227 = vmatprep.mubr.f32.mxu0 %v1301_v61 }
 0x3aa   : > { %2465 = verf.f32 %v1261_v42  ;;  %2228 = vmatmul.mubr.f32.gmra.mrb[38].mxu0 %v1302_v2  ;;  %v1304_v9 = vmul.f32 %v1288_v1, %v1240_v4 }
 0x3ab   : > { %v2456_v33 = vpop.eup %2455  ;;  %v1303_v38 = vmul.f32 %v1287_v3, %v1239_v52 }
 0x3ac   : > { %v2458_v6 = vpop.eup %2457  ;;  %v1290_v13 = vadd.f32 1.0, %v2456_v33 }
 0x3ad   : > { %v1289_v54 = vadd.f32 1.0, %v2458_v6  ;;  %2230 = vmatprep.mubr.f32.mxu0 %v1303_v38 }
 0x3ae   : > { %2231 = vmatmul.mubr.f32.gmra.mrb[40].mxu0 %v1304_v9  ;;  %v1306_v22 = vmul.f32 %v1290_v13, %v1242_v16 }
 0x3af   : > { %v2460_v50 = vpop.eup %2459  ;;  %v1305_v37 = vmul.f32 %v1289_v54, %v1241_v11 }
 0x3b0   : > { %v2462_v17 = vpop.eup %2461  ;;  %v1292_v36 = vadd.f32 1.0, %v2460_v50 }
 0x3b1   : > { %v1291_v0 = vadd.f32 1.0, %v2462_v17  ;;  %2233 = vmatprep.mubr.f32.mxu0 %v1305_v37 }
 0x3b2   : > { %2234 = vmatmul.mubr.f32.gmra.mrb[42].mxu0 %v1306_v22  ;;  %v1308_v14 = vmul.f32 %v1292_v36, %v1244_v40 }
 0x3b3   : > { %v2464_v25 = vpop.eup %2463  ;;  %v1307_v26 = vmul.f32 %v1291_v0, %v1243_v21 }
 0x3b4   : > { %v2466_v28 = vpop.eup %2465  ;;  %v1294_v20 = vadd.f32 1.0, %v2464_v25 }
 0x3b5   : > { %v1293_v32 = vadd.f32 1.0, %v2466_v28  ;;  %2236 = vmatprep.mubr.f32.mxu0 %v1307_v26 }
 0x3b6   : > { %2237 = vmatmul.mubr.f32.gmra.mrb[44].mxu0 %v1308_v14  ;;  %v1310_v30 = vmul.f32 %v1294_v20, %v1246_v7 }
 0x3b7   : > { %v1309_v34 = vmul.f32 %v1293_v32, %v1245_v48 }
 0x3b9   : > { %2239 = vmatprep.mubr.f32.mxu0 %v1309_v34 }
 0x3ba   : > { %2240 = vmatmul.mubr.f32.gmra.mrb[46].mxu0 %v1310_v30 }
 0x471   : > { %v2220_v8 = vpop.f32.mrb[32].mxu0 }
 0x472   : > { %v1408_v23 = vadd.f32 %v2220_v8, %v1875_v31  ;;  %v1402_v46 = vpop.f32.mrb[33].mxu0 }
 0x473   : > { %v1403_v56 = vadd.f32 %v1875_v31, %v1402_v46 }
 0x474   : > { %v1482_v60 = vadd.f32 %v1408_v23, %v2870_v12 }
 0x475   : > { %v1481_v59 = vadd.f32 %v1403_v56, %v2867_v10  ;;  %v2223_v29 = vpop.f32.mrb[34].mxu0 }
 0x476   : > { %v1418_v63 = vadd.f32 %v2223_v29, %v1875_v31  ;;  %v1412_v53 = vpop.f32.mrb[35].mxu0 }
 0x477   : > { %v1413_v44 = vadd.f32 %v1875_v31, %v1412_v53  ;;  %2250 = vmatprep.mubr.msk.f32.mxu1 %vm567_vm2, %v1481_v59 }
 0x478   : > { %2251 = vmatmul.mubr.msk.f32.vlgmr.msra.gmra.mrb[32].mxu1 %vm567_vm2, %v1482_v60  ;;  %v1484_v58 = vadd.f32 %v1418_v63, %v2880_v35 }
 0x479   : > { %v1483_v57 = vadd.f32 %v1413_v44, %v2877_v15  ;;  %v2226_v45 = vpop.f32.mrb[36].mxu0 }
 0x47a   : > { %v1428_v61 = vadd.f32 %v2226_v45, %v1875_v31  ;;  %v1422_v62 = vpop.f32.mrb[37].mxu0 }
 0x47b   : > { %v1423_v1 = vadd.f32 %v1875_v31, %v1422_v62  ;;  %2253 = vmatprep.mubr.msk.f32.mxu1 %vm567_vm2, %v1483_v57 }
 0x47c   : > { %2254 = vmatmul.mubr.msk.f32.gmra.mrb[34].mxu1 %vm567_vm2, %v1484_v58  ;;  %v1486_v42 = vadd.f32 %v1428_v61, %v2890_v39 }
 0x47d   : > { %v1485_v10 = vadd.f32 %v1423_v1, %v2887_v18  ;;  %v2229_v12 = vpop.f32.mrb[38].mxu0 }
 0x47e   : > { %v1438_v2 = vadd.f32 %v2229_v12, %v1875_v31  ;;  %v1432_v52 = vpop.f32.mrb[39].mxu0 }
 0x47f   : > { %v1433_v3 = vadd.f32 %v1875_v31, %v1432_v52  ;;  %2256 = vmatprep.mubr.msk.f32.mxu1 %vm567_vm2, %v1485_v10 }
 0x480   : > { %2257 = vmatmul.mubr.msk.f32.gmra.mrb[36].mxu1 %vm567_vm2, %v1486_v42  ;;  %v1488_v4 = vadd.f32 %v1438_v2, %v2900_v43 }
 0x481   : > { %v1487_v15 = vadd.f32 %v1433_v3, %v2897_v24  ;;  %v2232_v35 = vpop.f32.mrb[40].mxu0 }
 0x482   : > { %v1448_v33 = vadd.f32 %v2232_v35, %v1875_v31  ;;  %v1442_v38 = vpop.f32.mrb[41].mxu0 }
 0x483   : > { %v1443_v6 = vadd.f32 %v1875_v31, %v1442_v38  ;;  %2259 = vmatprep.mubr.msk.f32.mxu1 %vm567_vm2, %v1487_v15 }
 0x484   : > { %2260 = vmatmul.mubr.msk.f32.gmra.mrb[38].mxu1 %vm567_vm2, %v1488_v4  ;;  %v1490_v13 = vadd.f32 %v1448_v33, %v2910_v47 }
 0x485   : > { %v1489_v18 = vadd.f32 %v1443_v6, %v2907_v27  ;;  %v2235_v39 = vpop.f32.mrb[42].mxu0 }
 0x486   : > { %v1458_v9 = vadd.f32 %v2235_v39, %v1875_v31  ;;  %v1452_v11 = vpop.f32.mrb[43].mxu0 }
 0x487   : > { %v1453_v54 = vadd.f32 %v1875_v31, %v1452_v11  ;;  %2262 = vmatprep.mubr.msk.f32.mxu1 %vm567_vm2, %v1489_v18 }
 0x488   : > { %2263 = vmatmul.mubr.msk.f32.gmra.mrb[40].mxu1 %vm567_vm2, %v1490_v13  ;;  %v1492_v16 = vadd.f32 %v1458_v9, %v2920_v51 }
 0x489   : > { %v1491_v24 = vadd.f32 %v1453_v54, %v2917_v5  ;;  %v2238_v43 = vpop.f32.mrb[44].mxu0 }
 0x48a   : > { %v1468_v50 = vadd.f32 %v2238_v43, %v1875_v31  ;;  %v1462_v37 = vpop.f32.mrb[45].mxu0 }
 0x48b   : > { %v1463_v17 = vadd.f32 %v1875_v31, %v1462_v37  ;;  %2265 = vmatprep.mubr.msk.f32.mxu1 %vm567_vm2, %v1491_v24 }
 0x48c   : > { %2266 = vmatmul.mubr.msk.f32.gmra.mrb[42].mxu1 %vm567_vm2, %v1492_v16  ;;  %v1494_v36 = vadd.f32 %v1468_v50, %v2930_v55 }
 0x48d   : > { %v1493_v27 = vadd.f32 %v1463_v17, %v2927_v41  ;;  %v2241_v47 = vpop.f32.mrb[46].mxu0  ;;  %v1876_v41 = vld [vmem:[%s3140_s8] ss:$0 sm:$0xff] }
 0x48e   : > { %v1478_v22 = vadd.f32 %v2241_v47, %v1875_v31  ;;  %v1472_v21 = vpop.f32.mrb[47].mxu0 }
 0x48f   : > { %v1473_v5 = vadd.f32 %v1875_v31, %v1472_v21  ;;  %2268 = vmatprep.mubr.msk.f32.mxu1 %vm567_vm2, %v1493_v27 }
 0x490   : > { %2269 = vmatmul.mubr.msk.f32.gmra.mrb[44].mxu1 %vm567_vm2, %v1494_v36  ;;  %v1496_v0 = vadd.f32 %v1478_v22, %v2940_v19 }
 0x491   : > { %v1495_v51 = vadd.f32 %v1473_v5, %v2937_v49 }
 0x493   : > { %2271 = vmatprep.mubr.msk.f32.mxu1 %vm567_vm2, %v1495_v51 }
 0x494   : > { %2272 = vmatmul.mubr.msk.f32.gmra.mrb[46].mxu1 %vm567_vm2, %v1496_v0 }
 0x54b   : > { %v2252_v55 = vpop.f32.mrb[32].mxu1 }
 0x54c   : > { %v1628_v40 = vadd.f32 %v2252_v55, %v1876_v41  ;;  %v1622_v25 = vpop.f32.mrb[33].mxu1 }
 0x54d   : > { %v1623_v26 = vadd.f32 %v1876_v41, %v1622_v25 }
 0x54e   : > { %1702 = vst [vmem:[%s3062_s22 + $0x8] sm:$0xff] %v1628_v40 }
 0x54f   : > { %1701 = vst [vmem:[%s3062_s22] sm:$0xff] %v1623_v26  ;;  %v2255_v49 = vpop.f32.mrb[34].mxu1 }
 0x550   : > { %v1638_v19 = vadd.f32 %v2255_v49, %v1876_v41  ;;  %v1632_v28 = vpop.f32.mrb[35].mxu1 }
 0x551   : > { %v1633_v20 = vadd.f32 %v1876_v41, %v1632_v28 }
 0x552   : > { %1704 = vst [vmem:[%s3062_s22 + $0x18] sm:$0xff] %v1638_v19 }
 0x553   : > { %1703 = vst [vmem:[%s3062_s22 + $0x10] sm:$0xff] %v1633_v20  ;;  %v2258_v14 = vpop.f32.mrb[36].mxu1 }
 0x554   : > { %v1648_v48 = vadd.f32 %v2258_v14, %v1876_v41  ;;  %v1642_v32 = vpop.f32.mrb[37].mxu1 }
 0x555   : > { %v1643_v7 = vadd.f32 %v1876_v41, %v1642_v32 }
 0x556   : > { %1706 = vst [vmem:[%s3062_s22 + $0x28] sm:$0xff] %v1648_v48 }
 0x557   : > { %1705 = vst [vmem:[%s3062_s22 + $0x20] sm:$0xff] %v1643_v7  ;;  %v2261_v34 = vpop.f32.mrb[38].mxu1 }
 0x558   : > { %v1658_v30 = vadd.f32 %v2261_v34, %v1876_v41  ;;  %v1652_v31 = vpop.f32.mrb[39].mxu1 }
 0x559   : > { %v1653_v8 = vadd.f32 %v1876_v41, %v1652_v31 }
 0x55a   : > { %1708 = vst [vmem:[%s3062_s22 + $0x38] sm:$0xff] %v1658_v30 }
 0x55b   : > { %1707 = vst [vmem:[%s3062_s22 + $0x30] sm:$0xff] %v1653_v8  ;;  %v2264_v23 = vpop.f32.mrb[40].mxu1 }
 0x55c   : > { %v1668_v46 = vadd.f32 %v2264_v23, %v1876_v41  ;;  %v1662_v56 = vpop.f32.mrb[41].mxu1 }
 0x55d   : > { %v1663_v59 = vadd.f32 %v1876_v41, %v1662_v56 }
 0x55e   : > { %1710 = vst [vmem:[%s3062_s22 + $0x48] sm:$0xff] %v1668_v46 }
 0x55f   : > { %1709 = vst [vmem:[%s3062_s22 + $0x40] sm:$0xff] %v1663_v59  ;;  %v2267_v29 = vpop.f32.mrb[42].mxu1 }
 0x560   : > { %v1678_v60 = vadd.f32 %v2267_v29, %v1876_v41  ;;  %v1672_v63 = vpop.f32.mrb[43].mxu1 }
 0x561   : > { %v1673_v53 = vadd.f32 %v1876_v41, %v1672_v63 }
 0x562   : > { %1712 = vst [vmem:[%s3062_s22 + $0x58] sm:$0xff] %v1678_v60 }
 0x563   : > { %1711 = vst [vmem:[%s3062_s22 + $0x50] sm:$0xff] %v1673_v53  ;;  %v2270_v44 = vpop.f32.mrb[44].mxu1 }
 0x564   : > { %v1688_v57 = vadd.f32 %v2270_v44, %v1876_v41  ;;  %v1682_v45 = vpop.f32.mrb[45].mxu1 }
 0x565   : > { %v1683_v58 = vadd.f32 %v1876_v41, %v1682_v45 }
 0x566   : > { %1714 = vst [vmem:[%s3062_s22 + $0x68] sm:$0xff] %v1688_v57 }
 0x567   : > { %1713 = vst [vmem:[%s3062_s22 + $0x60] sm:$0xff] %v1683_v58  ;;  %v2273_v61 = vpop.f32.mrb[46].mxu1 }
 0x568   : > { %v1698_v62 = vadd.f32 %v2273_v61, %v1876_v41  ;;  %v1692_v1 = vpop.f32.mrb[47].mxu1 }
 0x569   : > { %v1693_v10 = vadd.f32 %v1876_v41, %v1692_v1 }
 0x56a   : > { %1716 = vst [vmem:[%s3062_s22 + $0x78] sm:$0xff] %v1698_v62 }
 0x56b   : > { %1715 = vst [vmem:[%s3062_s22 + $0x70] sm:$0xff] %v1693_v10 }
 0x56c   : > { %2480 = shalt.err (!%p2477_p3)
}
 0x56d   : > { %s2481_s14 = scalar_lea.hbm %s3083_s27, 2048  ;;  %s2485_s23 = scalar_lea.hbm %s3141_s9, 4096 }
 0x56e   : > { %p2482_p4 = scmp.ne.s32.totalorder %s3083_s27, %s2481_s14  ;;  %p2486_p9 = scmp.lt.u32.totalorder %s3083_s27, %s3141_s9 }
 0x56f   : > { %p2487_p10 = scmp.lt.u32.totalorder %s2485_s23, %s2481_s14  ;;  %p2489_p12 = scmp.lt.u32.totalorder %s2481_s14, %s3083_s27 }
 0x570   : > { %p2483_p7 = pnand %p2482_p4, %p2622_p5 }
 0x571   : > { %p2488_p11 = por %p2487_p10, %p2486_p9 }
 0x572   : > { %p2484_p8 = pneg %p2483_p7 }
 0x573   : > { %p2490_p13 = por %p2489_p12, %p2488_p11 }
 0x575   : > { %p2491_p0 = pnand %p2490_p13, %p2484_p8 }
 0x577   : > { %2494 = shalt.err (!%p2491_p0)
}
 0x578   : > { %s2532_s28 = smov 128   ;;  %s2533_s29 = smov 8  }
 0x579   : > { %2362 = dma.vmem_to_hbm [thread:$0]  (%p2622_p5), %s3085_s24, 2048, %s3083_s27, %s3091_s13, %s2532_s28, %s2532_s28, %s2533_s29  }
 0x57a PF: > { %p2368_p1 = scmp.ge.s32.totalorder %s2529_s12, 2  ;;  %s1746_s16 = sand.u32 1, %s2517_s30  }
 0x57b   : > { %s1747_s17 = scalar_lea.sflag [#allocation3], %s1746_s16 }
 0x57c   : > { %p2365_p2 = pnand %p2368_p1, %p2626_p6 }
 0x57e   : > { %2512 = dma.done.wait (!%p2365_p2), %s1747_s17, 2048  }
 0x57f   : > { %2514 = vsyncadd (!%p2365_p2), %s1747_s17, 4294965248  ;;  %p19_p3 = scmp.ge.s32.totalorder %s2609_s15, 4   ;;  %s3144_s30 = smov %s2521_s10 }
 0x580   : > { %s3145_s10 = smov %s2525_s11  ;;  %s3146_s11 = smov %s2620_s18 }
 0x581   : > { %s3147_s12 = smov %s2609_s15  ;;  %21 = sbr.rel (!%p19_p3) target bundleno = 3 (0x3), region = 95 }
 0x588   :  { %1752 = vsyncpa [#allocation3], 1 }
 0x589   :  { %1754 = vsyncpa [#allocation3 + $0x1], 1 }

</bundles_post_ra>
